<compile_context>
chip_gen: v7x
topology: tpu7x:2x2x1
jax: 0.10.0
libtpu: 0.0.40
codegen_flags: <defaults>
</compile_context>

<pallas_src>
import math

import jax
import jax.numpy as jnp
from jax import lax
from jax.experimental import pallas as pl
from jax.experimental.pallas import tpu as pltpu


_BYTES_F32 = 4
_TARGET_BLOCK_BYTES = 8 * 1024 * 1024   # ~8 MiB per output block (16 MiB double-buffered)


# ---------------------------------------------------------------------------
# Pallas kernel
# ---------------------------------------------------------------------------

def _alibi_bias_kernel(neg_slopes_ref, o_ref):
    """Writes one (Hb, TR, TC) tile of the (H, S_rows, S_cols) ALiBi bias.

    neg_slopes_ref : SMEM ref, shape (H,), float32, pre-negated per-head slopes
    o_ref          : VMEM ref, block shape (Hb, TR, TC) of the float32 output
    """
    ri = pl.program_id(0)     # row-tile index
    hi = pl.program_id(1)     # head-block index
    ci = pl.program_id(2)     # col-tile index
    hb, tr, tc = o_ref.shape

    # Distance slab |i - j|, computed once per tile (amortized over hb heads).
    # Fold the absolute row/col offsets into a single scalar delta = row0 - col0.
    delta = ri * tr - ci * tc
    rows = lax.broadcasted_iota(jnp.int32, (tr, tc), 0)
    cols = lax.broadcasted_iota(jnp.int32, (tr, tc), 1)
    dist = jnp.abs(rows - cols + delta).astype(jnp.float32)   # (tr, tc)

    # Per-head scale by the (pre-negated) slope, scalar read from SMEM.
    for h in range(hb):                                       # static unroll, hb small
        o_ref[h] = dist * neg_slopes_ref[hi * hb + h]


# ---------------------------------------------------------------------------
# Slopes (same recipe as the PyTorch module's _get_slopes)
# ---------------------------------------------------------------------------

def alibi_slopes(n_heads: int) -> jnp.ndarray:
    def pow2_slopes(n):
        start = 2.0 ** (-2.0 ** (-(math.log2(n) - 3)))
        return [start * (start ** i) for i in range(n)]

    if math.log2(n_heads).is_integer():
        s = pow2_slopes(n_heads)
    else:
        cp = 2 ** math.floor(math.log2(n_heads))
        s = pow2_slopes(cp) + pow2_slopes(2 * cp)[0::2][: n_heads - cp]
    return jnp.asarray(s, dtype=jnp.float32)


# ---------------------------------------------------------------------------
# Tiling helpers
# ---------------------------------------------------------------------------

def _round_up(x: int, m: int) -> int:
    return ((x + m - 1) // m) * m


def _largest_aligned_divisor(total: int, unit: int, cap: int) -> int:
    """Largest multiple of `unit` that divides `total` (itself a multiple of
    `unit`) and is <= cap; returns `total` when it already fits, never < unit."""
    if total <= cap:
        return total
    q = total // unit
    best = 1
    d = 1
    while d * d <= q:
        if q % d == 0:
            for cand in (d, q // d):
                if cand * unit <= cap and cand > best:
                    best = cand
        d += 1
    return best * unit


def _choose_tiles(n_heads: int, s_rows: int, s_cols: int):
    """Pick (Hb, tr, tc) so the output block is <= ~8 MiB f32, with tc the full
    (padded) column extent whenever possible (contiguous row-major slabs)."""
    tc = _largest_aligned_divisor(
        s_cols, 128, max(_TARGET_BLOCK_BYTES // (8 * _BYTES_F32), 128))
    budget_rows = max(_TARGET_BLOCK_BYTES // (tc * _BYTES_F32), 8)   # Hb * tr budget
    hb = 1
    for d in range(1, n_heads + 1):
        if n_heads % d == 0 and d * 8 <= budget_rows:
            hb = d
    tr = _largest_aligned_divisor(s_rows, 8, min(512, budget_rows // hb))
    return hb, tr, tc


# ---------------------------------------------------------------------------
# Wrapper
# ---------------------------------------------------------------------------

def alibi_positional_embedding(n_heads: int, seq_len: int) -> jnp.ndarray:
    """Pallas equivalent of ALiBiPositionalEmbedding.forward(seq_len).

    Returns float32 bias of shape (n_heads, seq_len, seq_len).
    """
    neg_slopes = -alibi_slopes(n_heads)              # (H,) f32, sign folded into slope

    # Pad to lane/sublane-friendly extents so every block stores full-width.
    s_rows = _round_up(seq_len, 8)
    s_cols = _round_up(seq_len, 128)

    hb, tr, tc = _choose_tiles(n_heads, s_rows, s_cols)
    grid = (s_rows // tr, n_heads // hb, s_cols // tc)   # row-tiles outermost (megacore)

    out_bytes = n_heads * s_rows * s_cols * _BYTES_F32
    cost = pl.CostEstimate(
        flops=2 * n_heads * s_rows * s_cols,
        transcendentals=0,
        bytes_accessed=out_bytes + n_heads * _BYTES_F32,
    )

    bias = pl.pallas_call(
        _alibi_bias_kernel,
        out_shape=jax.ShapeDtypeStruct((n_heads, s_rows, s_cols), jnp.float32),
        grid=grid,
        in_specs=[pl.BlockSpec(memory_space=pltpu.MemorySpace.SMEM)],   # slopes whole-array in SMEM
        out_specs=pl.BlockSpec((hb, tr, tc), lambda ri, hi, ci: (hi, ri, ci)),
        compiler_params=pltpu.CompilerParams(
            dimension_semantics=("parallel", "parallel", "parallel"),
            vmem_limit_bytes=32 * 1024 * 1024),
        cost_estimate=cost,
    )(neg_slopes)

    if s_rows != seq_len or s_cols != seq_len:
        bias = bias[:, :seq_len, :seq_len]
    return bias


# Pure-JAX reference (mirrors the PyTorch _compute_bias) for correctness check.
def alibi_bias_ref(n_heads: int, seq_len: int) -> jnp.ndarray:
    pos = jnp.arange(seq_len, dtype=jnp.float32)
    pos_diff = -jnp.abs(pos[None, :] - pos[:, None])             # (S, S)
    slopes = alibi_slopes(n_heads).reshape(-1, 1, 1)             # (H, 1, 1)
    return pos_diff[None, :, :] * slopes                         # (H, S, S)


# ---------------------------------------------------------------------------
# Main
# ---------------------------------------------------------------------------

if __name__ == "__main__":
    # The module's forward has no tensor inputs (only seq_len); key kept for
    # the deterministic-setup convention.
    _ = jax.random.PRNGKey(0)

    # TODO(synk): the PyTorch module's stateful buffer caching / lazy recompute
    # beyond max_seq_len (with logger warning) has no kernel equivalent; the
    # wrapper computes the bias for the requested seq_len directly, which
    # yields the same forward output.

    # Power-of-two heads, aligned seq_len.
    n_heads, seq_len = 8, 128
    bias = alibi_positional_embedding(n_heads, seq_len)
    jax.block_until_ready(bias)
    assert bias.shape == (n_heads, seq_len, seq_len)
    assert bias.dtype == jnp.float32
    assert jnp.allclose(bias, alibi_bias_ref(n_heads, seq_len), rtol=1e-6, atol=1e-6)

    # Non-power-of-two heads, non-(8,128)-aligned seq_len (padding + slice path).
    bias2 = alibi_positional_embedding(6, 100)
    jax.block_until_ready(bias2)
    assert bias2.shape == (6, 100, 100)
    assert jnp.allclose(bias2, alibi_bias_ref(6, 100), rtol=1e-6, atol=1e-6)

    print("KERNEL_OK")
</pallas_src>

<mosaic_0001>
module attributes {stable_mosaic.version = 11 : i64} {
  func.func @_alibi_bias_kernel(%arg0: i32, %arg1: i32, %arg2: i32, %arg3: memref<8xf32, #tpu.memory_space<smem>>, %arg4: memref<8x128x128xf32, #tpu.memory_space<vmem>>) attributes {dimension_semantics = [#tpu.dimension_semantics<parallel>, #tpu.dimension_semantics<parallel>, #tpu.dimension_semantics<parallel>], iteration_bounds = array<i64: 1, 1, 1>, scalar_prefetch = 0 : i64, scratch_operands = 0 : i64, tpu.core_type = #tpu.core_type<tc>, window_params = [{transform_indices = @transform_0, window_bounds = array<i64: 8>}, {transform_indices = @transform_1, window_bounds = array<i64: 8, 128, 128>}]} {
    %c128_i32 = arith.constant 128 : i32
    %0 = arith.muli %arg0, %c128_i32 : i32
    %c128_i32_0 = arith.constant 128 : i32
    %1 = arith.muli %arg2, %c128_i32_0 : i32
    %2 = arith.subi %0, %1 : i32
    %3 = tpu.iota {dimensions = array<i32: 0>} : vector<128x128xi32>
    %4 = tpu.iota {dimensions = array<i32: 1>} : vector<128x128xi32>
    %5 = arith.subi %3, %4 : vector<128x128xi32>
    %6 = vector.broadcast %2 : i32 to vector<128x128xi32>
    %7 = arith.addi %5, %6 : vector<128x128xi32>
    %8 = math.absi %7 : vector<128x128xi32>
    %9 = arith.sitofp %8 : vector<128x128xi32> to vector<128x128xf32>
    %c8_i32 = arith.constant 8 : i32
    %10 = arith.muli %arg1, %c8_i32 : i32
    %c0_i32 = arith.constant 0 : i32
    %11 = arith.addi %10, %c0_i32 : i32
    %12 = arith.index_cast %11 : i32 to index
    %13 = memref.load %arg3[%12] : memref<8xf32, #tpu.memory_space<smem>>
    %14 = vector.broadcast %13 : f32 to vector<128x128xf32>
    %15 = arith.mulf %9, %14 : vector<128x128xf32>
    %c0 = arith.constant 0 : index
    %c0_1 = arith.constant 0 : index
    %c0_2 = arith.constant 0 : index
    %16 = vector.load %arg4[%c0, %c0_1, %c0_2] : memref<8x128x128xf32, #tpu.memory_space<vmem>>, vector<1x128x128xf32>
    %17 = vector.shape_cast %16 : vector<1x128x128xf32> to vector<128x128xf32>
    %18 = vector.shape_cast %15 : vector<128x128xf32> to vector<1x128x128xf32>
    tpu.vector_store %arg4[%c0, %c0_1, %c0_2], %18 {strides = array<i32>} : memref<8x128x128xf32, #tpu.memory_space<vmem>>, vector<1x128x128xf32>,
    %c8_i32_3 = arith.constant 8 : i32
    %19 = arith.muli %arg1, %c8_i32_3 : i32
    %c1_i32 = arith.constant 1 : i32
    %20 = arith.addi %19, %c1_i32 : i32
    %21 = arith.index_cast %20 : i32 to index
    %22 = memref.load %arg3[%21] : memref<8xf32, #tpu.memory_space<smem>>
    %23 = vector.broadcast %22 : f32 to vector<128x128xf32>
    %24 = arith.mulf %9, %23 : vector<128x128xf32>
    %c1 = arith.constant 1 : index
    %c0_4 = arith.constant 0 : index
    %c0_5 = arith.constant 0 : index
    %25 = vector.load %arg4[%c1, %c0_4, %c0_5] : memref<8x128x128xf32, #tpu.memory_space<vmem>>, vector<1x128x128xf32>
    %26 = vector.shape_cast %25 : vector<1x128x128xf32> to vector<128x128xf32>
    %27 = vector.shape_cast %24 : vector<128x128xf32> to vector<1x128x128xf32>
    tpu.vector_store %arg4[%c1, %c0_4, %c0_5], %27 {strides = array<i32>} : memref<8x128x128xf32, #tpu.memory_space<vmem>>, vector<1x128x128xf32>,
    %c8_i32_6 = arith.constant 8 : i32
    %28 = arith.muli %arg1, %c8_i32_6 : i32
    %c2_i32 = arith.constant 2 : i32
    %29 = arith.addi %28, %c2_i32 : i32
    %30 = arith.index_cast %29 : i32 to index
    %31 = memref.load %arg3[%30] : memref<8xf32, #tpu.memory_space<smem>>
    %32 = vector.broadcast %31 : f32 to vector<128x128xf32>
    %33 = arith.mulf %9, %32 : vector<128x128xf32>
    %c2 = arith.constant 2 : index
    %c0_7 = arith.constant 0 : index
    %c0_8 = arith.constant 0 : index
    %34 = vector.load %arg4[%c2, %c0_7, %c0_8] : memref<8x128x128xf32, #tpu.memory_space<vmem>>, vector<1x128x128xf32>
    %35 = vector.shape_cast %34 : vector<1x128x128xf32> to vector<128x128xf32>
    %36 = vector.shape_cast %33 : vector<128x128xf32> to vector<1x128x128xf32>
    tpu.vector_store %arg4[%c2, %c0_7, %c0_8], %36 {strides = array<i32>} : memref<8x128x128xf32, #tpu.memory_space<vmem>>, vector<1x128x128xf32>,
    %c8_i32_9 = arith.constant 8 : i32
    %37 = arith.muli %arg1, %c8_i32_9 : i32
    %c3_i32 = arith.constant 3 : i32
    %38 = arith.addi %37, %c3_i32 : i32
    %39 = arith.index_cast %38 : i32 to index
    %40 = memref.load %arg3[%39] : memref<8xf32, #tpu.memory_space<smem>>
    %41 = vector.broadcast %40 : f32 to vector<128x128xf32>
    %42 = arith.mulf %9, %41 : vector<128x128xf32>
    %c3 = arith.constant 3 : index
    %c0_10 = arith.constant 0 : index
    %c0_11 = arith.constant 0 : index
    %43 = vector.load %arg4[%c3, %c0_10, %c0_11] : memref<8x128x128xf32, #tpu.memory_space<vmem>>, vector<1x128x128xf32>
    %44 = vector.shape_cast %43 : vector<1x128x128xf32> to vector<128x128xf32>
    %45 = vector.shape_cast %42 : vector<128x128xf32> to vector<1x128x128xf32>
    tpu.vector_store %arg4[%c3, %c0_10, %c0_11], %45 {strides = array<i32>} : memref<8x128x128xf32, #tpu.memory_space<vmem>>, vector<1x128x128xf32>,
    %c8_i32_12 = arith.constant 8 : i32
    %46 = arith.muli %arg1, %c8_i32_12 : i32
    %c4_i32 = arith.constant 4 : i32
    %47 = arith.addi %46, %c4_i32 : i32
    %48 = arith.index_cast %47 : i32 to index
    %49 = memref.load %arg3[%48] : memref<8xf32, #tpu.memory_space<smem>>
    %50 = vector.broadcast %49 : f32 to vector<128x128xf32>
    %51 = arith.mulf %9, %50 : vector<128x128xf32>
    %c4 = arith.constant 4 : index
    %c0_13 = arith.constant 0 : index
    %c0_14 = arith.constant 0 : index
    %52 = vector.load %arg4[%c4, %c0_13, %c0_14] : memref<8x128x128xf32, #tpu.memory_space<vmem>>, vector<1x128x128xf32>
    %53 = vector.shape_cast %52 : vector<1x128x128xf32> to vector<128x128xf32>
    %54 = vector.shape_cast %51 : vector<128x128xf32> to vector<1x128x128xf32>
    tpu.vector_store %arg4[%c4, %c0_13, %c0_14], %54 {strides = array<i32>} : memref<8x128x128xf32, #tpu.memory_space<vmem>>, vector<1x128x128xf32>,
    %c8_i32_15 = arith.constant 8 : i32
    %55 = arith.muli %arg1, %c8_i32_15 : i32
    %c5_i32 = arith.constant 5 : i32
    %56 = arith.addi %55, %c5_i32 : i32
    %57 = arith.index_cast %56 : i32 to index
    %58 = memref.load %arg3[%57] : memref<8xf32, #tpu.memory_space<smem>>
    %59 = vector.broadcast %58 : f32 to vector<128x128xf32>
    %60 = arith.mulf %9, %59 : vector<128x128xf32>
    %c5 = arith.constant 5 : index
    %c0_16 = arith.constant 0 : index
    %c0_17 = arith.constant 0 : index
    %61 = vector.load %arg4[%c5, %c0_16, %c0_17] : memref<8x128x128xf32, #tpu.memory_space<vmem>>, vector<1x128x128xf32>
    %62 = vector.shape_cast %61 : vector<1x128x128xf32> to vector<128x128xf32>
    %63 = vector.shape_cast %60 : vector<128x128xf32> to vector<1x128x128xf32>
    tpu.vector_store %arg4[%c5, %c0_16, %c0_17], %63 {strides = array<i32>} : memref<8x128x128xf32, #tpu.memory_space<vmem>>, vector<1x128x128xf32>,
    %c8_i32_18 = arith.constant 8 : i32
    %64 = arith.muli %arg1, %c8_i32_18 : i32
    %c6_i32 = arith.constant 6 : i32
    %65 = arith.addi %64, %c6_i32 : i32
    %66 = arith.index_cast %65 : i32 to index
    %67 = memref.load %arg3[%66] : memref<8xf32, #tpu.memory_space<smem>>
    %68 = vector.broadcast %67 : f32 to vector<128x128xf32>
    %69 = arith.mulf %9, %68 : vector<128x128xf32>
    %c6 = arith.constant 6 : index
    %c0_19 = arith.constant 0 : index
    %c0_20 = arith.constant 0 : index
    %70 = vector.load %arg4[%c6, %c0_19, %c0_20] : memref<8x128x128xf32, #tpu.memory_space<vmem>>, vector<1x128x128xf32>
    %71 = vector.shape_cast %70 : vector<1x128x128xf32> to vector<128x128xf32>
    %72 = vector.shape_cast %69 : vector<128x128xf32> to vector<1x128x128xf32>
    tpu.vector_store %arg4[%c6, %c0_19, %c0_20], %72 {strides = array<i32>} : memref<8x128x128xf32, #tpu.memory_space<vmem>>, vector<1x128x128xf32>,
    %c8_i32_21 = arith.constant 8 : i32
    %73 = arith.muli %arg1, %c8_i32_21 : i32
    %c7_i32 = arith.constant 7 : i32
    %74 = arith.addi %73, %c7_i32 : i32
    %75 = arith.index_cast %74 : i32 to index
    %76 = memref.load %arg3[%75] : memref<8xf32, #tpu.memory_space<smem>>
    %77 = vector.broadcast %76 : f32 to vector<128x128xf32>
    %78 = arith.mulf %9, %77 : vector<128x128xf32>
    %c7 = arith.constant 7 : index
    %c0_22 = arith.constant 0 : index
    %c0_23 = arith.constant 0 : index
    %79 = vector.load %arg4[%c7, %c0_22, %c0_23] : memref<8x128x128xf32, #tpu.memory_space<vmem>>, vector<1x128x128xf32>
    %80 = vector.shape_cast %79 : vector<1x128x128xf32> to vector<128x128xf32>
    %81 = vector.shape_cast %78 : vector<128x128xf32> to vector<1x128x128xf32>
    tpu.vector_store %arg4[%c7, %c0_22, %c0_23], %81 {strides = array<i32>} : memref<8x128x128xf32, #tpu.memory_space<vmem>>, vector<1x128x128xf32>,
    return
  }
  func.func @transform_0(%arg0: i32, %arg1: i32, %arg2: i32) -> i32 {
    %c0_i32 = arith.constant 0 : i32
    %c0_i32_0 = arith.constant 0 : i32
    return %c0_i32 : i32
  }
  func.func @transform_1(%arg0: i32, %arg1: i32, %arg2: i32) -> (i32, i32, i32) {
    %c0_i32 = arith.constant 0 : i32
    return %arg1, %arg0, %arg2 : i32, i32, i32
  }
}

</mosaic_0001>

<bundles_post_ra>
// kernel: tpu_custom_call.1
= control target key start
LH: loop header
LB: loop body
LE: loop exit
PB: predicated region body
PF: predicated region fallthrough
CT: control target
= control target key end

     0   :  { %6 = vsyncpa [#allocation4], 0  ;;  %s833_s0 = inlined_call_operand.hbm [shape: f32[8], index: 0, kind: input, shape index: {}]   ;;  %s834_s1 = inlined_call_operand.hbm [shape: f32[8,128,128], index: 1, kind: output, shape index: {}]  }
   0x1   :  { %7 = vsyncpa [#allocation3], 0  ;;  %s470_s8 = scalar_lea.hbm %s833_s0, 16 }
   0x2   :  { %p471_p0 = scmp.ne.s32.totalorder %s833_s0, %s470_s8  ;;  %p474_p1 = scmp.lt.u32.totalorder %s470_s8, %s833_s0 }
   0x4   :  { %p476_p2 = pnand %p474_p1, %p471_p0 }
   0x6   :  { %479 = shalt.err (!%p476_p2)
}
   0x7   :  { %s506_s13 = smov [#allocation2]  }
   0x8   :  { %15 = dma.hbm_to_smem %s833_s0, 16, %s506_s13, [#allocation4]  }
   0x9   :  { %502 = dma.done.wait [#allocation4], 16  }
   0xa   :  { %503 = vsyncadd [#allocation4], 4294967280 }
   0xb   :  { %19 = sfence }
   0xc   :  { %v23_v0 = vlaneseq  ;;  %s140_s16 = sld [smem:[#allocation2]]  ;;  %s597_s0 = sld [smem:[#allocation2 + $0x1]] }
   0xd   :  { %s606_s17 = sld [smem:[#allocation2 + $0x2]]  ;;  %s614_s18 = sld [smem:[#allocation2 + $0x3]] }
   0xe   :  { %v532_v1 = vshrl.u32 %v23_v0, 7  ;;  %v534_v2 = vand.u32 127, %v23_v0  ;;  %s616_s19 = sld [smem:[#allocation2 + $0x4]]  ;;  %s682_s20 = sld [smem:[#allocation2 + $0x5]] }
   0xf   :  { %s692_s21 = sld [smem:[#allocation2 + $0x6]]  ;;  %s694_s22 = sld [smem:[#allocation2 + $0x7]] }
  0x10   :  { %v42_v3 = vsub.s32 %v532_v1, %v534_v2  ;;  %v25_v4 = vadd.s32 8, %v532_v1  ;;  %v26_v5 = vadd.s32 16, %v532_v1  ;;  %v27_v6 = vadd.s32 24, %v532_v1  ;;  %s507_s23 = smov [#allocation5]  }
  0x11   :  { %v28_v7 = vadd.s32 32, %v532_v1  ;;  %v29_v8 = vadd.s32 40, %v532_v1  ;;  %v30_v9 = vadd.s32 48, %v532_v1  ;;  %v31_v10 = vadd.s32 56, %v532_v1  ;;  %s431_s24 = sshll.u32 %s507_s23, 4  ;;  %s432_s24 = int_to_ptr.vmem [resolvable:$true] %s431_s24 }
  0x12   :  { %v76_v11 = vsub.s32 0, %v42_v3  ;;  %v545_v12 = vstv %s140_s16  ;;  %v43_v13 = vsub.s32 %v25_v4, %v534_v2  ;;  %v44_v14 = vsub.s32 %v26_v5, %v534_v2  ;;  %s480_s25 = scalar_lea.vmem %s432_s24, 16384  ;;  %p485_p4 = scmp.lt.s32.totalorder %s432_s24, %s432_s24 }
  0x13   :  { %v45_v15 = vsub.s32 %v27_v6, %v534_v2  ;;  %v46_v16 = vsub.s32 %v28_v7, %v534_v2  ;;  %v47_v17 = vsub.s32 %v29_v8, %v534_v2  ;;  %v48_v18 = vsub.s32 %v30_v9, %v534_v2  ;;  %p481_p3 = scmp.ne.s32.totalorder %s432_s24, %s480_s25  ;;  %p486_p5 = scmp.lt.s32.totalorder %s480_s25, %s480_s25 }
  0x14   :  { %v443_v19 = vmin.u32 %v76_v11, %v42_v3  ;;  %v79_v20 = vsub.s32 0, %v43_v13  ;;  %v82_v21 = vsub.s32 0, %v44_v14  ;;  %v49_v22 = vsub.s32 %v31_v10, %v534_v2 }
  0x15   :  { %v85_v23 = vsub.s32 0, %v45_v15  ;;  %v88_v24 = vsub.s32 0, %v46_v16  ;;  %v91_v25 = vsub.s32 0, %v47_v17  ;;  %v94_v26 = vsub.s32 0, %v48_v18  ;;  %p487_p6 = por %p486_p5, %p485_p4 }
  0x16   :  { %v554_v27 = vcvt.s32.f32 %v443_v19  ;;  %v444_v28 = vmin.u32 %v79_v20, %v43_v13  ;;  %v445_v29 = vmin.u32 %v82_v21, %v44_v14  ;;  %v97_v30 = vsub.s32 0, %v49_v22 }
  0x17   :  { %v446_v31 = vmin.u32 %v85_v23, %v45_v15  ;;  %v447_v32 = vmin.u32 %v88_v24, %v46_v16  ;;  %v448_v33 = vmin.u32 %v91_v25, %v47_v17  ;;  %v449_v34 = vmin.u32 %v94_v26, %v48_v18  ;;  %p488_p7 = pnand %p487_p6, %p481_p3 }
  0x18   :  { %v142_v35 = vmul.f32 %v545_v12, %v554_v27  ;;  %v558_v36 = vcvt.s32.f32 %v444_v28  ;;  %v560_v37 = vcvt.s32.f32 %v445_v29  ;;  %v450_v38 = vmin.u32 %v97_v30, %v49_v22 }
  0x19   :  { %v562_v39 = vcvt.s32.f32 %v446_v31  ;;  %v564_v40 = vcvt.s32.f32 %v447_v32  ;;  %v566_v41 = vcvt.s32.f32 %v448_v33  ;;  %v568_v42 = vcvt.s32.f32 %v449_v34 }
  0x1a   :  { %158 = vst [vmem:[#allocation5] sm:$0xff] %v142_v35  ;;  %v143_v43 = vmul.f32 %v545_v12, %v558_v36  ;;  %v144_v44 = vmul.f32 %v545_v12, %v560_v37  ;;  %v574_v45 = vcvt.s32.f32 %v450_v38  ;;  %v32_v46 = vadd.s32 64, %v532_v1 }
  0x1b   :  { %v145_v47 = vmul.f32 %v545_v12, %v562_v39  ;;  %v146_v48 = vmul.f32 %v545_v12, %v564_v40  ;;  %v147_v49 = vmul.f32 %v545_v12, %v566_v41  ;;  %v148_v50 = vmul.f32 %v545_v12, %v568_v42 }
  0x1c   :  { %159 = vst [vmem:[#allocation5 + $0x8] sm:$0xff] %v143_v43  ;;  %160 = vst [vmem:[#allocation5 + $0x10] sm:$0xff] %v144_v44  ;;  %v149_v51 = vmul.f32 %v545_v12, %v574_v45  ;;  %v50_v52 = vsub.s32 %v32_v46, %v534_v2  ;;  %v33_v53 = vadd.s32 72, %v532_v1  ;;  %v34_v54 = vadd.s32 80, %v532_v1 }
  0x1d   :  { %161 = vst [vmem:[#allocation5 + $0x18] sm:$0xff] %v145_v47  ;;  %162 = vst [vmem:[#allocation5 + $0x20] sm:$0xff] %v146_v48  ;;  %v35_v55 = vadd.s32 88, %v532_v1  ;;  %v36_v56 = vadd.s32 96, %v532_v1  ;;  %v37_v57 = vadd.s32 104, %v532_v1  ;;  %v38_v58 = vadd.s32 112, %v532_v1 }
  0x1e   :  { %163 = vst [vmem:[#allocation5 + $0x28] sm:$0xff] %v147_v49  ;;  %164 = vst [vmem:[#allocation5 + $0x30] sm:$0xff] %v148_v50  ;;  %v100_v59 = vsub.s32 0, %v50_v52  ;;  %v51_v60 = vsub.s32 %v33_v53, %v534_v2  ;;  %v52_v61 = vsub.s32 %v34_v54, %v534_v2  ;;  %v39_v62 = vadd.s32 120, %v532_v1 }
  0x1f   :  { %165 = vst [vmem:[#allocation5 + $0x38] sm:$0xff] %v149_v51  ;;  %v53_v63 = vsub.s32 %v35_v55, %v534_v2  ;;  %v54_v0 = vsub.s32 %v36_v56, %v534_v2  ;;  %v55_v3 = vsub.s32 %v37_v57, %v534_v2  ;;  %v56_v4 = vsub.s32 %v38_v58, %v534_v2 }
  0x20   :  { %v451_v5 = vmin.u32 %v100_v59, %v50_v52  ;;  %v103_v6 = vsub.s32 0, %v51_v60  ;;  %v106_v7 = vsub.s32 0, %v52_v61  ;;  %v57_v8 = vsub.s32 %v39_v62, %v534_v2 }
  0x21   :  { %v109_v9 = vsub.s32 0, %v53_v63  ;;  %v112_v10 = vsub.s32 0, %v54_v0  ;;  %v115_v11 = vsub.s32 0, %v55_v3  ;;  %v118_v13 = vsub.s32 0, %v56_v4 }
  0x22   :  { %v604_v1 = vcvt.s32.f32 %v451_v5  ;;  %v452_v14 = vmin.u32 %v103_v6, %v51_v60  ;;  %v453_v15 = vmin.u32 %v106_v7, %v52_v61  ;;  %v121_v16 = vsub.s32 0, %v57_v8 }
  0x23   :  { %v454_v17 = vmin.u32 %v109_v9, %v53_v63  ;;  %v455_v18 = vmin.u32 %v112_v10, %v54_v0  ;;  %v456_v19 = vmin.u32 %v115_v11, %v55_v3  ;;  %v457_v20 = vmin.u32 %v118_v13, %v56_v4 }
  0x24   :  { %v150_v21 = vmul.f32 %v545_v12, %v604_v1  ;;  %v610_v2 = vcvt.s32.f32 %v452_v14  ;;  %v612_v22 = vcvt.s32.f32 %v453_v15  ;;  %v458_v23 = vmin.u32 %v121_v16, %v57_v8 }
  0x25   :  { %v618_v24 = vcvt.s32.f32 %v454_v17  ;;  %v620_v25 = vcvt.s32.f32 %v455_v18  ;;  %v622_v26 = vcvt.s32.f32 %v456_v19  ;;  %v624_v28 = vcvt.s32.f32 %v457_v20 }
  0x26   :  { %166 = vst [vmem:[#allocation5 + $0x40] sm:$0xff] %v150_v21  ;;  %v151_v29 = vmul.f32 %v545_v12, %v610_v2  ;;  %v152_v30 = vmul.f32 %v545_v12, %v612_v22  ;;  %v630_v31 = vcvt.s32.f32 %v458_v23  ;;  %v176_v32 = vstv %s597_s0 }
  0x27   :  { %v153_v33 = vmul.f32 %v545_v12, %v618_v24  ;;  %v154_v34 = vmul.f32 %v545_v12, %v620_v25  ;;  %v155_v35 = vmul.f32 %v545_v12, %v622_v26  ;;  %v156_v38 = vmul.f32 %v545_v12, %v624_v28 }
  0x28   :  { %167 = vst [vmem:[#allocation5 + $0x48] sm:$0xff] %v151_v29  ;;  %168 = vst [vmem:[#allocation5 + $0x50] sm:$0xff] %v152_v30  ;;  %v157_v43 = vmul.f32 %v545_v12, %v630_v31  ;;  %v177_v44 = vmul.f32 %v176_v32, %v554_v27  ;;  %v178_v46 = vmul.f32 %v176_v32, %v558_v36  ;;  %v212_v60 = vstv %s606_s17 }
  0x29   :  { %v179_v47 = vmul.f32 %v176_v32, %v560_v37  ;;  %169 = vst [vmem:[#allocation5 + $0x58] sm:$0xff] %v153_v33  ;;  %170 = vst [vmem:[#allocation5 + $0x60] sm:$0xff] %v154_v34  ;;  %v180_v48 = vmul.f32 %v176_v32, %v562_v39  ;;  %v181_v49 = vmul.f32 %v176_v32, %v564_v40  ;;  %v661_v61 = vstv %s614_s18 }
  0x2a   :  { %171 = vst [vmem:[#allocation5 + $0x68] sm:$0xff] %v155_v35  ;;  %172 = vst [vmem:[#allocation5 + $0x70] sm:$0xff] %v156_v38  ;;  %v182_v50 = vmul.f32 %v176_v32, %v566_v41  ;;  %v183_v51 = vmul.f32 %v176_v32, %v568_v42  ;;  %v184_v12 = vmul.f32 %v176_v32, %v574_v45  ;;  %v664_v62 = vstv %s616_s19 }
  0x2b   :  { %173 = vst [vmem:[#allocation5 + $0x78] sm:$0xff] %v157_v43  ;;  %194 = vst [vmem:[#allocation5 + $0x80] sm:$0xff] %v177_v44  ;;  %v185_v52 = vmul.f32 %v176_v32, %v604_v1  ;;  %v186_v53 = vmul.f32 %v176_v32, %v610_v2  ;;  %v187_v54 = vmul.f32 %v176_v32, %v612_v22 }
  0x2c   :  { %195 = vst [vmem:[#allocation5 + $0x88] sm:$0xff] %v178_v46  ;;  %196 = vst [vmem:[#allocation5 + $0x90] sm:$0xff] %v179_v47  ;;  %v188_v55 = vmul.f32 %v176_v32, %v618_v24  ;;  %v189_v56 = vmul.f32 %v176_v32, %v620_v25  ;;  %v190_v57 = vmul.f32 %v176_v32, %v622_v26 }
  0x2d   :  { %197 = vst [vmem:[#allocation5 + $0x98] sm:$0xff] %v180_v48  ;;  %198 = vst [vmem:[#allocation5 + $0xa0] sm:$0xff] %v181_v49  ;;  %v191_v58 = vmul.f32 %v176_v32, %v624_v28  ;;  %v192_v59 = vmul.f32 %v176_v32, %v630_v31  ;;  %v213_v63 = vmul.f32 %v212_v60, %v554_v27 }
  0x2e   :  { %199 = vst [vmem:[#allocation5 + $0xa8] sm:$0xff] %v182_v50  ;;  %200 = vst [vmem:[#allocation5 + $0xb0] sm:$0xff] %v183_v51  ;;  %v214_v0 = vmul.f32 %v212_v60, %v558_v36  ;;  %v215_v3 = vmul.f32 %v212_v60, %v560_v37  ;;  %v216_v4 = vmul.f32 %v212_v60, %v562_v39 }
  0x2f   :  { %201 = vst [vmem:[#allocation5 + $0xb8] sm:$0xff] %v184_v12  ;;  %202 = vst [vmem:[#allocation5 + $0xc0] sm:$0xff] %v185_v52  ;;  %v217_v5 = vmul.f32 %v212_v60, %v564_v40  ;;  %v218_v6 = vmul.f32 %v212_v60, %v566_v41  ;;  %v219_v7 = vmul.f32 %v212_v60, %v568_v42 }
  0x30   :  { %203 = vst [vmem:[#allocation5 + $0xc8] sm:$0xff] %v186_v53  ;;  %204 = vst [vmem:[#allocation5 + $0xd0] sm:$0xff] %v187_v54  ;;  %v220_v8 = vmul.f32 %v212_v60, %v574_v45  ;;  %v221_v9 = vmul.f32 %v212_v60, %v604_v1  ;;  %v222_v10 = vmul.f32 %v212_v60, %v610_v2 }
  0x31   :  { %205 = vst [vmem:[#allocation5 + $0xd8] sm:$0xff] %v188_v55  ;;  %206 = vst [vmem:[#allocation5 + $0xe0] sm:$0xff] %v189_v56  ;;  %v223_v11 = vmul.f32 %v212_v60, %v612_v22  ;;  %v224_v13 = vmul.f32 %v212_v60, %v618_v24  ;;  %v225_v14 = vmul.f32 %v212_v60, %v620_v25 }
  0x32   :  { %207 = vst [vmem:[#allocation5 + $0xe8] sm:$0xff] %v190_v57  ;;  %208 = vst [vmem:[#allocation5 + $0xf0] sm:$0xff] %v191_v58  ;;  %v226_v15 = vmul.f32 %v212_v60, %v622_v26  ;;  %v227_v16 = vmul.f32 %v212_v60, %v624_v28  ;;  %v228_v17 = vmul.f32 %v212_v60, %v630_v31 }
  0x33   :  { %209 = vst [vmem:[#allocation5 + $0xf8] sm:$0xff] %v192_v59  ;;  %230 = vst [vmem:[#allocation5 + $0x100] sm:$0xff] %v213_v63  ;;  %v249_v18 = vmul.f32 %v661_v61, %v554_v27  ;;  %v250_v19 = vmul.f32 %v661_v61, %v558_v36  ;;  %v251_v20 = vmul.f32 %v661_v61, %v560_v37 }
  0x34   :  { %231 = vst [vmem:[#allocation5 + $0x108] sm:$0xff] %v214_v0  ;;  %232 = vst [vmem:[#allocation5 + $0x110] sm:$0xff] %v215_v3  ;;  %v252_v21 = vmul.f32 %v661_v61, %v562_v39  ;;  %v253_v23 = vmul.f32 %v661_v61, %v564_v40  ;;  %v254_v29 = vmul.f32 %v661_v61, %v566_v41  ;;  %v320_v0 = vstv %s682_s20 }
  0x35   :  { %233 = vst [vmem:[#allocation5 + $0x118] sm:$0xff] %v216_v4  ;;  %234 = vst [vmem:[#allocation5 + $0x120] sm:$0xff] %v217_v5  ;;  %v255_v30 = vmul.f32 %v661_v61, %v568_v42  ;;  %v256_v32 = vmul.f32 %v661_v61, %v574_v45  ;;  %v257_v33 = vmul.f32 %v661_v61, %v604_v1  ;;  %v356_v3 = vstv %s692_s21 }
  0x36   :  { %235 = vst [vmem:[#allocation5 + $0x128] sm:$0xff] %v218_v6  ;;  %236 = vst [vmem:[#allocation5 + $0x130] sm:$0xff] %v219_v7  ;;  %v258_v34 = vmul.f32 %v661_v61, %v610_v2  ;;  %v259_v35 = vmul.f32 %v661_v61, %v612_v22  ;;  %v260_v38 = vmul.f32 %v661_v61, %v618_v24  ;;  %v755_v4 = vstv %s694_s22 }
  0x37   :  { %237 = vst [vmem:[#allocation5 + $0x138] sm:$0xff] %v220_v8  ;;  %238 = vst [vmem:[#allocation5 + $0x140] sm:$0xff] %v221_v9  ;;  %v261_v43 = vmul.f32 %v661_v61, %v620_v25  ;;  %v262_v44 = vmul.f32 %v661_v61, %v622_v26  ;;  %v263_v46 = vmul.f32 %v661_v61, %v624_v28 }
  0x38   :  { %239 = vst [vmem:[#allocation5 + $0x148] sm:$0xff] %v222_v10  ;;  %240 = vst [vmem:[#allocation5 + $0x150] sm:$0xff] %v223_v11  ;;  %v264_v47 = vmul.f32 %v661_v61, %v630_v31  ;;  %v285_v48 = vmul.f32 %v664_v62, %v554_v27  ;;  %v286_v49 = vmul.f32 %v664_v62, %v558_v36 }
  0x39   :  { %241 = vst [vmem:[#allocation5 + $0x158] sm:$0xff] %v224_v13  ;;  %242 = vst [vmem:[#allocation5 + $0x160] sm:$0xff] %v225_v14  ;;  %v287_v50 = vmul.f32 %v664_v62, %v560_v37  ;;  %v288_v51 = vmul.f32 %v664_v62, %v562_v39  ;;  %v289_v12 = vmul.f32 %v664_v62, %v564_v40 }
  0x3a   :  { %243 = vst [vmem:[#allocation5 + $0x168] sm:$0xff] %v226_v15  ;;  %244 = vst [vmem:[#allocation5 + $0x170] sm:$0xff] %v227_v16  ;;  %v290_v52 = vmul.f32 %v664_v62, %v566_v41  ;;  %v291_v53 = vmul.f32 %v664_v62, %v568_v42  ;;  %v292_v54 = vmul.f32 %v664_v62, %v574_v45 }
  0x3b   :  { %245 = vst [vmem:[#allocation5 + $0x178] sm:$0xff] %v228_v17  ;;  %266 = vst [vmem:[#allocation5 + $0x180] sm:$0xff] %v249_v18  ;;  %v293_v55 = vmul.f32 %v664_v62, %v604_v1  ;;  %v294_v56 = vmul.f32 %v664_v62, %v610_v2  ;;  %v295_v57 = vmul.f32 %v664_v62, %v612_v22 }
  0x3c   :  { %267 = vst [vmem:[#allocation5 + $0x188] sm:$0xff] %v250_v19  ;;  %268 = vst [vmem:[#allocation5 + $0x190] sm:$0xff] %v251_v20  ;;  %v296_v58 = vmul.f32 %v664_v62, %v618_v24  ;;  %v297_v59 = vmul.f32 %v664_v62, %v620_v25  ;;  %v298_v60 = vmul.f32 %v664_v62, %v622_v26 }
  0x3d   :  { %269 = vst [vmem:[#allocation5 + $0x198] sm:$0xff] %v252_v21  ;;  %270 = vst [vmem:[#allocation5 + $0x1a0] sm:$0xff] %v253_v23  ;;  %v299_v61 = vmul.f32 %v664_v62, %v624_v28  ;;  %v300_v63 = vmul.f32 %v664_v62, %v630_v31  ;;  %v321_v5 = vmul.f32 %v320_v0, %v554_v27 }
  0x3e   :  { %271 = vst [vmem:[#allocation5 + $0x1a8] sm:$0xff] %v254_v29  ;;  %272 = vst [vmem:[#allocation5 + $0x1b0] sm:$0xff] %v255_v30  ;;  %v322_v6 = vmul.f32 %v320_v0, %v558_v36  ;;  %v323_v7 = vmul.f32 %v320_v0, %v560_v37  ;;  %v324_v62 = vmul.f32 %v320_v0, %v562_v39 }
  0x3f   :  { %273 = vst [vmem:[#allocation5 + $0x1b8] sm:$0xff] %v256_v32  ;;  %274 = vst [vmem:[#allocation5 + $0x1c0] sm:$0xff] %v257_v33  ;;  %v325_v8 = vmul.f32 %v320_v0, %v564_v40  ;;  %v326_v9 = vmul.f32 %v320_v0, %v566_v41  ;;  %v327_v10 = vmul.f32 %v320_v0, %v568_v42 }
  0x40   :  { %275 = vst [vmem:[#allocation5 + $0x1c8] sm:$0xff] %v258_v34  ;;  %276 = vst [vmem:[#allocation5 + $0x1d0] sm:$0xff] %v259_v35  ;;  %v328_v11 = vmul.f32 %v320_v0, %v574_v45  ;;  %v329_v13 = vmul.f32 %v320_v0, %v604_v1  ;;  %v330_v14 = vmul.f32 %v320_v0, %v610_v2 }
  0x41   :  { %277 = vst [vmem:[#allocation5 + $0x1d8] sm:$0xff] %v260_v38  ;;  %278 = vst [vmem:[#allocation5 + $0x1e0] sm:$0xff] %v261_v43  ;;  %v331_v15 = vmul.f32 %v320_v0, %v612_v22  ;;  %v332_v16 = vmul.f32 %v320_v0, %v618_v24  ;;  %v333_v17 = vmul.f32 %v320_v0, %v620_v25 }
  0x42   :  { %279 = vst [vmem:[#allocation5 + $0x1e8] sm:$0xff] %v262_v44  ;;  %280 = vst [vmem:[#allocation5 + $0x1f0] sm:$0xff] %v263_v46  ;;  %v334_v18 = vmul.f32 %v320_v0, %v622_v26  ;;  %v335_v19 = vmul.f32 %v320_v0, %v624_v28  ;;  %v336_v20 = vmul.f32 %v320_v0, %v630_v31 }
  0x43   :  { %281 = vst [vmem:[#allocation5 + $0x1f8] sm:$0xff] %v264_v47  ;;  %302 = vst [vmem:[#allocation5 + $0x200] sm:$0xff] %v285_v48  ;;  %v357_v21 = vmul.f32 %v356_v3, %v554_v27  ;;  %v358_v23 = vmul.f32 %v356_v3, %v558_v36  ;;  %v359_v29 = vmul.f32 %v356_v3, %v560_v37 }
  0x44   :  { %303 = vst [vmem:[#allocation5 + $0x208] sm:$0xff] %v286_v49  ;;  %304 = vst [vmem:[#allocation5 + $0x210] sm:$0xff] %v287_v50  ;;  %v360_v30 = vmul.f32 %v356_v3, %v562_v39  ;;  %v361_v32 = vmul.f32 %v356_v3, %v564_v40  ;;  %v362_v33 = vmul.f32 %v356_v3, %v566_v41 }
  0x45   :  { %305 = vst [vmem:[#allocation5 + $0x218] sm:$0xff] %v288_v51  ;;  %306 = vst [vmem:[#allocation5 + $0x220] sm:$0xff] %v289_v12  ;;  %v363_v34 = vmul.f32 %v356_v3, %v568_v42  ;;  %v364_v35 = vmul.f32 %v356_v3, %v574_v45  ;;  %v365_v38 = vmul.f32 %v356_v3, %v604_v1 }
  0x46   :  { %307 = vst [vmem:[#allocation5 + $0x228] sm:$0xff] %v290_v52  ;;  %308 = vst [vmem:[#allocation5 + $0x230] sm:$0xff] %v291_v53  ;;  %v366_v43 = vmul.f32 %v356_v3, %v610_v2  ;;  %v367_v44 = vmul.f32 %v356_v3, %v612_v22  ;;  %v368_v46 = vmul.f32 %v356_v3, %v618_v24 }
  0x47   :  { %309 = vst [vmem:[#allocation5 + $0x238] sm:$0xff] %v292_v54  ;;  %310 = vst [vmem:[#allocation5 + $0x240] sm:$0xff] %v293_v55  ;;  %v369_v47 = vmul.f32 %v356_v3, %v620_v25  ;;  %v370_v48 = vmul.f32 %v356_v3, %v622_v26  ;;  %v371_v49 = vmul.f32 %v356_v3, %v624_v28 }
  0x48   :  { %311 = vst [vmem:[#allocation5 + $0x248] sm:$0xff] %v294_v56  ;;  %312 = vst [vmem:[#allocation5 + $0x250] sm:$0xff] %v295_v57  ;;  %v372_v50 = vmul.f32 %v356_v3, %v630_v31  ;;  %v393_v51 = vmul.f32 %v755_v4, %v554_v27  ;;  %v394_v12 = vmul.f32 %v755_v4, %v558_v36 }
  0x49   :  { %313 = vst [vmem:[#allocation5 + $0x258] sm:$0xff] %v296_v58  ;;  %314 = vst [vmem:[#allocation5 + $0x260] sm:$0xff] %v297_v59  ;;  %v395_v52 = vmul.f32 %v755_v4, %v560_v37  ;;  %v396_v53 = vmul.f32 %v755_v4, %v562_v39  ;;  %v397_v54 = vmul.f32 %v755_v4, %v564_v40 }
  0x4a   :  { %315 = vst [vmem:[#allocation5 + $0x268] sm:$0xff] %v298_v60  ;;  %316 = vst [vmem:[#allocation5 + $0x270] sm:$0xff] %v299_v61  ;;  %v398_v27 = vmul.f32 %v755_v4, %v566_v41  ;;  %v399_v36 = vmul.f32 %v755_v4, %v568_v42  ;;  %v400_v37 = vmul.f32 %v755_v4, %v574_v45 }
  0x4b   :  { %317 = vst [vmem:[#allocation5 + $0x278] sm:$0xff] %v300_v63  ;;  %338 = vst [vmem:[#allocation5 + $0x280] sm:$0xff] %v321_v5  ;;  %v401_v39 = vmul.f32 %v755_v4, %v604_v1  ;;  %v402_v55 = vmul.f32 %v755_v4, %v610_v2  ;;  %v403_v40 = vmul.f32 %v755_v4, %v612_v22 }
  0x4c   :  { %339 = vst [vmem:[#allocation5 + $0x288] sm:$0xff] %v322_v6  ;;  %340 = vst [vmem:[#allocation5 + $0x290] sm:$0xff] %v323_v7  ;;  %v404_v41 = vmul.f32 %v755_v4, %v618_v24  ;;  %v405_v42 = vmul.f32 %v755_v4, %v620_v25  ;;  %v406_v45 = vmul.f32 %v755_v4, %v622_v26 }
  0x4d   :  { %341 = vst [vmem:[#allocation5 + $0x298] sm:$0xff] %v324_v62  ;;  %342 = vst [vmem:[#allocation5 + $0x2a0] sm:$0xff] %v325_v8  ;;  %v407_v1 = vmul.f32 %v755_v4, %v624_v28  ;;  %v408_v2 = vmul.f32 %v755_v4, %v630_v31 }
  0x4e   :  { %343 = vst [vmem:[#allocation5 + $0x2a8] sm:$0xff] %v326_v9  ;;  %344 = vst [vmem:[#allocation5 + $0x2b0] sm:$0xff] %v327_v10 }
  0x4f   :  { %345 = vst [vmem:[#allocation5 + $0x2b8] sm:$0xff] %v328_v11  ;;  %346 = vst [vmem:[#allocation5 + $0x2c0] sm:$0xff] %v329_v13 }
  0x50   :  { %347 = vst [vmem:[#allocation5 + $0x2c8] sm:$0xff] %v330_v14  ;;  %348 = vst [vmem:[#allocation5 + $0x2d0] sm:$0xff] %v331_v15 }
  0x51   :  { %349 = vst [vmem:[#allocation5 + $0x2d8] sm:$0xff] %v332_v16  ;;  %350 = vst [vmem:[#allocation5 + $0x2e0] sm:$0xff] %v333_v17 }
  0x52   :  { %351 = vst [vmem:[#allocation5 + $0x2e8] sm:$0xff] %v334_v18  ;;  %352 = vst [vmem:[#allocation5 + $0x2f0] sm:$0xff] %v335_v19 }
  0x53   :  { %353 = vst [vmem:[#allocation5 + $0x2f8] sm:$0xff] %v336_v20  ;;  %374 = vst [vmem:[#allocation5 + $0x300] sm:$0xff] %v357_v21 }
  0x54   :  { %375 = vst [vmem:[#allocation5 + $0x308] sm:$0xff] %v358_v23  ;;  %376 = vst [vmem:[#allocation5 + $0x310] sm:$0xff] %v359_v29 }
  0x55   :  { %377 = vst [vmem:[#allocation5 + $0x318] sm:$0xff] %v360_v30  ;;  %378 = vst [vmem:[#allocation5 + $0x320] sm:$0xff] %v361_v32 }
  0x56   :  { %379 = vst [vmem:[#allocation5 + $0x328] sm:$0xff] %v362_v33  ;;  %380 = vst [vmem:[#allocation5 + $0x330] sm:$0xff] %v363_v34 }
  0x57   :  { %381 = vst [vmem:[#allocation5 + $0x338] sm:$0xff] %v364_v35  ;;  %382 = vst [vmem:[#allocation5 + $0x340] sm:$0xff] %v365_v38 }
  0x58   :  { %383 = vst [vmem:[#allocation5 + $0x348] sm:$0xff] %v366_v43  ;;  %384 = vst [vmem:[#allocation5 + $0x350] sm:$0xff] %v367_v44 }
  0x59   :  { %385 = vst [vmem:[#allocation5 + $0x358] sm:$0xff] %v368_v46  ;;  %386 = vst [vmem:[#allocation5 + $0x360] sm:$0xff] %v369_v47 }
  0x5a   :  { %387 = vst [vmem:[#allocation5 + $0x368] sm:$0xff] %v370_v48  ;;  %388 = vst [vmem:[#allocation5 + $0x370] sm:$0xff] %v371_v49 }
  0x5b   :  { %389 = vst [vmem:[#allocation5 + $0x378] sm:$0xff] %v372_v50  ;;  %410 = vst [vmem:[#allocation5 + $0x380] sm:$0xff] %v393_v51 }
  0x5c   :  { %411 = vst [vmem:[#allocation5 + $0x388] sm:$0xff] %v394_v12  ;;  %412 = vst [vmem:[#allocation5 + $0x390] sm:$0xff] %v395_v52 }
  0x5d   :  { %413 = vst [vmem:[#allocation5 + $0x398] sm:$0xff] %v396_v53  ;;  %414 = vst [vmem:[#allocation5 + $0x3a0] sm:$0xff] %v397_v54 }
  0x5e   :  { %415 = vst [vmem:[#allocation5 + $0x3a8] sm:$0xff] %v398_v27  ;;  %416 = vst [vmem:[#allocation5 + $0x3b0] sm:$0xff] %v399_v36 }
  0x5f   :  { %417 = vst [vmem:[#allocation5 + $0x3b8] sm:$0xff] %v400_v37  ;;  %418 = vst [vmem:[#allocation5 + $0x3c0] sm:$0xff] %v401_v39 }
  0x60   :  { %419 = vst [vmem:[#allocation5 + $0x3c8] sm:$0xff] %v402_v55  ;;  %420 = vst [vmem:[#allocation5 + $0x3d0] sm:$0xff] %v403_v40 }
  0x61   :  { %421 = vst [vmem:[#allocation5 + $0x3d8] sm:$0xff] %v404_v41  ;;  %422 = vst [vmem:[#allocation5 + $0x3e0] sm:$0xff] %v405_v42 }
  0x62   :  { %423 = vst [vmem:[#allocation5 + $0x3e8] sm:$0xff] %v406_v45  ;;  %424 = vst [vmem:[#allocation5 + $0x3f0] sm:$0xff] %v407_v1 }
  0x63   :  { %425 = vst [vmem:[#allocation5 + $0x3f8] sm:$0xff] %v408_v2 }
  0x64   :  { %491 = shalt.err (!%p488_p7)
}
  0x65   :  { %s492_s28 = scalar_lea.hbm %s834_s1, 16384 }
  0x66   :  { %p493_p8 = scmp.ne.s32.totalorder %s834_s1, %s492_s28  ;;  %p496_p9 = scmp.lt.u32.totalorder %s492_s28, %s834_s1 }
  0x68   :  { %p498_p10 = pnand %p496_p9, %p493_p8 }
  0x6a   :  { %501 = shalt.err (!%p498_p10)
}
  0x6b   :  { %s508_s4 = smov 128   ;;  %s509_s5 = smov 8  }
  0x6c   :  { %437 = dma.vmem_to_hbm [thread:$0]  %s432_s24, 16384, %s834_s1, [#allocation3], %s508_s4, %s508_s4, %s509_s5  }
  0x6d   :  { %504 = dma.done.wait [#allocation3], 16384  }
  0x6e   :  { %505 = vsyncadd [#allocation3], 4294950912 }
  0x6f   :  { %441 = vsyncpa [#allocation3], 1 }
  0x70   :  { %442 = vsyncpa [#allocation4], 1 }

</bundles_post_ra>
